<compile_context>
chip_gen: v5e
topology: v5e:2x2
jax: 0.10.0
libtpu: 0.0.40
codegen_flags: <defaults>
</compile_context>

<pallas_src>
import functools

import jax
import jax.numpy as jnp
from jax import lax
from jax.experimental import pallas as pl
from jax.experimental.pallas import tpu as pltpu


def lstm_tagger_kernel(x_ref, wih_ref, whh_ref, b_ref, wout_ref, bout_ref,
                       out_ref, xg_sc, hs_sc):
    """LSTM recurrence with hoisted input/output projections.

    x_ref:    (S, E)   embedded inputs
    wih_ref:  (E, 4H)  input->gates weights (transposed, gate order i,f,g,o)
    whh_ref:  (H, 4H)  hidden->gates weights (transposed)
    b_ref:    (1, 4H)  combined bias (b_ih + b_hh)
    wout_ref: (H, T)   hidden2tag weights (transposed)
    bout_ref: (1, T)   hidden2tag bias
    out_ref:  (S, T)   tag space output
    xg_sc:    (S, 4H)  scratch: precomputed X @ W_ih + b
    hs_sc:    (S, H)   scratch: per-step hidden states
    """
    S = x_ref.shape[0]
    H = whh_ref.shape[0]

    # Batched input projection for all timesteps (one MXU matmul, bias folded
    # in here so it is off the per-step critical path).
    xg_sc[...] = (jnp.dot(x_ref[...], wih_ref[...],
                          preferred_element_type=jnp.float32)
                  + b_ref[...])                                       # (S, 4H)

    def step(t, carry):
        h, c = carry                                                  # (1, H)
        # Only the hidden->gates matmul remains on the serial path.
        gates = (xg_sc[pl.ds(t, 1), :]
                 + jnp.dot(h, whh_ref[...],
                           preferred_element_type=jnp.float32))       # (1, 4H)

        # Two full-vreg EUP ops instead of four sliced ones.
        sig = jax.nn.sigmoid(gates)
        tnh = jnp.tanh(gates)
        i_g = sig[:, 0 * H:1 * H]
        f_g = sig[:, 1 * H:2 * H]
        g_g = tnh[:, 2 * H:3 * H]
        o_g = sig[:, 3 * H:4 * H]

        c_new = f_g * c + i_g * g_g
        h_new = o_g * jnp.tanh(c_new)

        # Store h_t for the post-loop batched tag projection (not on the
        # loop-carried dependency chain).
        hs_sc[pl.ds(t, 1), :] = h_new
        return (h_new, c_new)

    h0 = jnp.zeros((1, H), jnp.float32)
    c0 = jnp.zeros((1, H), jnp.float32)
    lax.fori_loop(0, S, step, (h0, c0), unroll=True)

    # Hoisted hidden2tag projection: one (S,H)@(H,T) matmul + bias + store.
    out_ref[...] = (jnp.dot(hs_sc[...], wout_ref[...],
                            preferred_element_type=jnp.float32)
                    + bout_ref[...])


def prepare_params(params):
    """One-time weight prep (transposes + bias folding), outside the hot path."""
    H = params["w_hh"].shape[1]
    T = params["w_out"].shape[0]
    return {
        "embedding": params["embedding"],                             # (V, E)
        "wih_t": jnp.transpose(params["w_ih"]),                       # (E, 4H)
        "whh_t": jnp.transpose(params["w_hh"]),                       # (H, 4H)
        "b": (params["b_ih"] + params["b_hh"]).reshape(1, 4 * H),     # (1, 4H)
        "wout_t": jnp.transpose(params["w_out"]),                     # (H, T)
        "bout": params["b_out"].reshape(1, T),                        # (1, T)
    }


@jax.jit
def lstm_tagger_forward(sentence, prepared):
    """sentence: (1, S) int32.  Returns (1, S, tagset_size) float32."""
    emb_table = prepared["embedding"]
    S = sentence.shape[1]
    H = prepared["whh_t"].shape[0]
    T = prepared["wout_t"].shape[1]

    # Glue: embedding lookup (gather) stays in plain JAX.
    embeds = jnp.take(emb_table, sentence[0], axis=0)                 # (S, E)

    tag_space = pl.pallas_call(
        lstm_tagger_kernel,
        out_shape=jax.ShapeDtypeStruct((S, T), jnp.float32),
        in_specs=[pl.BlockSpec(memory_space=pltpu.MemorySpace.VMEM)] * 6,
        out_specs=pl.BlockSpec(memory_space=pltpu.MemorySpace.VMEM),
        scratch_shapes=[pltpu.VMEM((S, 4 * H), jnp.float32),
                        pltpu.VMEM((S, H), jnp.float32)],
    )(embeds, prepared["wih_t"], prepared["whh_t"], prepared["b"],
      prepared["wout_t"], prepared["bout"])

    return tag_space[None, :, :]                                      # (1,S,T)


def lstm_tagger_reference(sentence, params):
    """Pure-JAX reference matching PyTorch nn.LSTM / nn.Linear semantics."""
    emb_table = params["embedding"]
    w_ih, w_hh = params["w_ih"], params["w_hh"]
    b = params["b_ih"] + params["b_hh"]
    w_out, b_out = params["w_out"], params["b_out"]
    H = w_hh.shape[1]

    embeds = jnp.take(emb_table, sentence[0], axis=0)                 # (S, E)

    def cell(carry, x_t):
        h, c = carry
        gates = x_t @ w_ih.T + h @ w_hh.T + b
        i_g = jax.nn.sigmoid(gates[0 * H:1 * H])
        f_g = jax.nn.sigmoid(gates[1 * H:2 * H])
        g_g = jnp.tanh(gates[2 * H:3 * H])
        o_g = jax.nn.sigmoid(gates[3 * H:4 * H])
        c_new = f_g * c + i_g * g_g
        h_new = o_g * jnp.tanh(c_new)
        return (h_new, c_new), h_new

    init = (jnp.zeros((H,), jnp.float32), jnp.zeros((H,), jnp.float32))
    _, hs = lax.scan(cell, init, embeds)                              # (S, H)
    return (hs @ w_out.T + b_out)[None, :, :]                         # (1,S,T)


def init_params(key, vocab_size, embedding_dim, hidden_dim, tagset_size):
    ks = jax.random.split(key, 7)
    s_lstm = 1.0 / jnp.sqrt(hidden_dim)
    s_lin = 1.0 / jnp.sqrt(hidden_dim)
    return {
        "embedding": jax.random.normal(
            ks[0], (vocab_size, embedding_dim), jnp.float32),
        "w_ih": jax.random.uniform(
            ks[1], (4 * hidden_dim, embedding_dim), jnp.float32,
            -s_lstm, s_lstm),
        "w_hh": jax.random.uniform(
            ks[2], (4 * hidden_dim, hidden_dim), jnp.float32,
            -s_lstm, s_lstm),
        "b_ih": jax.random.uniform(
            ks[3], (4 * hidden_dim,), jnp.float32, -s_lstm, s_lstm),
        "b_hh": jax.random.uniform(
            ks[4], (4 * hidden_dim,), jnp.float32, -s_lstm, s_lstm),
        "w_out": jax.random.uniform(
            ks[5], (tagset_size, hidden_dim), jnp.float32, -s_lin, s_lin),
        "b_out": jax.random.uniform(
            ks[6], (tagset_size,), jnp.float32, -s_lin, s_lin),
    }


if __name__ == "__main__":
    embedding_dim = 32
    hidden_dim = 32          # 4H = 128 -> gates are exactly one vreg row
    vocab_size = 50
    tagset_size = 8
    seq_len = 8

    key = jax.random.PRNGKey(0)
    k_params, k_sent = jax.random.split(key)
    params = init_params(k_params, vocab_size, embedding_dim, hidden_dim,
                         tagset_size)
    sentence = jax.random.randint(k_sent, (1, seq_len), 0, vocab_size,
                                  dtype=jnp.int32)

    prepared = prepare_params(params)                # one-time weight prep
    out = lstm_tagger_forward(sentence, prepared)
    out = jax.block_until_ready(out)

    ref = lstm_tagger_reference(sentence, params)
    ref = jax.block_until_ready(ref)

    assert out.shape == (1, seq_len, tagset_size), out.shape
    assert jnp.allclose(out, ref, atol=1e-5, rtol=1e-5), (
        "mismatch vs reference")
    print("KERNEL_OK")
</pallas_src>

<mosaic_0001>
module attributes {stable_mosaic.version = 11 : i64} {
  func.func @lstm_tagger_kernel(%arg0: memref<8x32xf32, #tpu.memory_space<vmem>>, %arg1: memref<32x128xf32, #tpu.memory_space<vmem>>, %arg2: memref<32x128xf32, #tpu.memory_space<vmem>>, %arg3: memref<1x128xf32, #tpu.memory_space<vmem>>, %arg4: memref<32x8xf32, #tpu.memory_space<vmem>>, %arg5: memref<1x8xf32, #tpu.memory_space<vmem>>, %arg6: memref<8x8xf32, #tpu.memory_space<vmem>>, %arg7: memref<8x128xf32, #tpu.memory_space<vmem>>, %arg8: memref<8x32xf32, #tpu.memory_space<vmem>>) attributes {dimension_semantics = [], scalar_prefetch = 0 : i64, scratch_operands = 2 : i64, tpu.core_type = #tpu.core_type<tc>} {
    %c0 = arith.constant 0 : index
    %c0_0 = arith.constant 0 : index
    %0 = vector.load %arg0[%c0, %c0_0] : memref<8x32xf32, #tpu.memory_space<vmem>>, vector<8x32xf32>
    %c0_1 = arith.constant 0 : index
    %c0_2 = arith.constant 0 : index
    %1 = vector.load %arg1[%c0_1, %c0_2] : memref<32x128xf32, #tpu.memory_space<vmem>>, vector<32x128xf32>
    %cst = arith.constant dense<0.000000e+00> : vector<8x128xf32>
    %2 = tpu.matmul %0, %1, %cst {dimension_numbers = #tpu.dot_dimension_numbers<[1], [0], [0], [1], [0, 0, 1, 1], [], []>} : vector<8x32xf32>, vector<32x128xf32>, vector<8x128xf32> -> vector<8x128xf32>
    %c0_3 = arith.constant 0 : index
    %c0_4 = arith.constant 0 : index
    %3 = vector.load %arg3[%c0_3, %c0_4] : memref<1x128xf32, #tpu.memory_space<vmem>>, vector<1x128xf32>
    %4 = vector.broadcast %3 : vector<1x128xf32> to vector<8x128xf32>
    %5 = arith.addf %2, %4 : vector<8x128xf32>
    %c0_5 = arith.constant 0 : index
    %c0_6 = arith.constant 0 : index
    %6 = vector.load %arg7[%c0_5, %c0_6] : memref<8x128xf32, #tpu.memory_space<vmem>>, vector<8x128xf32>
    tpu.vector_store %arg7[%c0_5, %c0_6], %5 {strides = array<i32>} : memref<8x128xf32, #tpu.memory_space<vmem>>, vector<8x128xf32>,
    %cst_7 = arith.constant 0.000000e+00 : f32
    %7 = vector.broadcast %cst_7 : f32 to vector<1x32xf32>
    %cst_8 = arith.constant 0.000000e+00 : f32
    %8 = vector.broadcast %cst_8 : f32 to vector<1x32xf32>
    %c0_i32 = arith.constant 0 : i32
    %9 = arith.index_cast %c0_i32 : i32 to index
    %c0_9 = arith.constant 0 : index
    %10 = vector.load %arg7[%9, %c0_9] : memref<8x128xf32, #tpu.memory_space<vmem>>, vector<1x128xf32>
    %c0_10 = arith.constant 0 : index
    %c0_11 = arith.constant 0 : index
    %11 = vector.load %arg2[%c0_10, %c0_11] : memref<32x128xf32, #tpu.memory_space<vmem>>, vector<32x128xf32>
    %cst_12 = arith.constant dense<0.000000e+00> : vector<1x128xf32>
    %12 = tpu.matmul %7, %11, %cst_12 {dimension_numbers = #tpu.dot_dimension_numbers<[1], [0], [0], [1], [0, 0, 1, 1], [], []>} : vector<1x32xf32>, vector<32x128xf32>, vector<1x128xf32> -> vector<1x128xf32>
    %13 = arith.addf %10, %12 : vector<1x128xf32>
    %14 = arith.negf %13 : vector<1x128xf32>
    %15 = math.exp %14 : vector<1x128xf32>
    %cst_13 = arith.constant 1.000000e+00 : f32
    %16 = vector.broadcast %cst_13 : f32 to vector<1x128xf32>
    %17 = arith.addf %16, %15 : vector<1x128xf32>
    %18 = arith.divf %16, %17 : vector<1x128xf32>
    %19 = math.tanh %13 : vector<1x128xf32>
    %20 = vector.extract_strided_slice %18 {offsets = [0, 0], sizes = [1, 32], strides = [1, 1]} : vector<1x128xf32> to vector<1x32xf32>
    %21 = vector.extract_strided_slice %18 {offsets = [0, 32], sizes = [1, 32], strides = [1, 1]} : vector<1x128xf32> to vector<1x32xf32>
    %22 = vector.extract_strided_slice %19 {offsets = [0, 64], sizes = [1, 32], strides = [1, 1]} : vector<1x128xf32> to vector<1x32xf32>
    %23 = vector.extract_strided_slice %18 {offsets = [0, 96], sizes = [1, 32], strides = [1, 1]} : vector<1x128xf32> to vector<1x32xf32>
    %24 = arith.mulf %21, %8 : vector<1x32xf32>
    %25 = arith.mulf %20, %22 : vector<1x32xf32>
    %26 = arith.addf %24, %25 : vector<1x32xf32>
    %27 = math.tanh %26 : vector<1x32xf32>
    %28 = arith.mulf %23, %27 : vector<1x32xf32>
    %29 = arith.index_cast %c0_i32 : i32 to index
    %c0_14 = arith.constant 0 : index
    %30 = vector.load %arg8[%29, %c0_14] : memref<8x32xf32, #tpu.memory_space<vmem>>, vector<1x32xf32>
    tpu.vector_store %arg8[%29, %c0_14], %28 {strides = array<i32>} : memref<8x32xf32, #tpu.memory_space<vmem>>, vector<1x32xf32>,
    %c1_i32 = arith.constant 1 : i32
    %31 = arith.index_cast %c1_i32 : i32 to index
    %c0_15 = arith.constant 0 : index
    %32 = vector.load %arg7[%31, %c0_15] : memref<8x128xf32, #tpu.memory_space<vmem>>, vector<1x128xf32>
    %c0_16 = arith.constant 0 : index
    %c0_17 = arith.constant 0 : index
    %33 = vector.load %arg2[%c0_16, %c0_17] : memref<32x128xf32, #tpu.memory_space<vmem>>, vector<32x128xf32>
    %cst_18 = arith.constant dense<0.000000e+00> : vector<1x128xf32>
    %34 = tpu.matmul %28, %33, %cst_18 {dimension_numbers = #tpu.dot_dimension_numbers<[1], [0], [0], [1], [0, 0, 1, 1], [], []>} : vector<1x32xf32>, vector<32x128xf32>, vector<1x128xf32> -> vector<1x128xf32>
    %35 = arith.addf %32, %34 : vector<1x128xf32>
    %36 = arith.negf %35 : vector<1x128xf32>
    %37 = math.exp %36 : vector<1x128xf32>
    %cst_19 = arith.constant 1.000000e+00 : f32
    %38 = vector.broadcast %cst_19 : f32 to vector<1x128xf32>
    %39 = arith.addf %38, %37 : vector<1x128xf32>
    %40 = arith.divf %38, %39 : vector<1x128xf32>
    %41 = math.tanh %35 : vector<1x128xf32>
    %42 = vector.extract_strided_slice %40 {offsets = [0, 0], sizes = [1, 32], strides = [1, 1]} : vector<1x128xf32> to vector<1x32xf32>
    %43 = vector.extract_strided_slice %40 {offsets = [0, 32], sizes = [1, 32], strides = [1, 1]} : vector<1x128xf32> to vector<1x32xf32>
    %44 = vector.extract_strided_slice %41 {offsets = [0, 64], sizes = [1, 32], strides = [1, 1]} : vector<1x128xf32> to vector<1x32xf32>
    %45 = vector.extract_strided_slice %40 {offsets = [0, 96], sizes = [1, 32], strides = [1, 1]} : vector<1x128xf32> to vector<1x32xf32>
    %46 = arith.mulf %43, %26 : vector<1x32xf32>
    %47 = arith.mulf %42, %44 : vector<1x32xf32>
    %48 = arith.addf %46, %47 : vector<1x32xf32>
    %49 = math.tanh %48 : vector<1x32xf32>
    %50 = arith.mulf %45, %49 : vector<1x32xf32>
    %51 = arith.index_cast %c1_i32 : i32 to index
    %c0_20 = arith.constant 0 : index
    %52 = vector.load %arg8[%51, %c0_20] : memref<8x32xf32, #tpu.memory_space<vmem>>, vector<1x32xf32>
    tpu.vector_store %arg8[%51, %c0_20], %50 {strides = array<i32>} : memref<8x32xf32, #tpu.memory_space<vmem>>, vector<1x32xf32>,
    %c2_i32 = arith.constant 2 : i32
    %53 = arith.index_cast %c2_i32 : i32 to index
    %c0_21 = arith.constant 0 : index
    %54 = vector.load %arg7[%53, %c0_21] : memref<8x128xf32, #tpu.memory_space<vmem>>, vector<1x128xf32>
    %c0_22 = arith.constant 0 : index
    %c0_23 = arith.constant 0 : index
    %55 = vector.load %arg2[%c0_22, %c0_23] : memref<32x128xf32, #tpu.memory_space<vmem>>, vector<32x128xf32>
    %cst_24 = arith.constant dense<0.000000e+00> : vector<1x128xf32>
    %56 = tpu.matmul %50, %55, %cst_24 {dimension_numbers = #tpu.dot_dimension_numbers<[1], [0], [0], [1], [0, 0, 1, 1], [], []>} : vector<1x32xf32>, vector<32x128xf32>, vector<1x128xf32> -> vector<1x128xf32>
    %57 = arith.addf %54, %56 : vector<1x128xf32>
    %58 = arith.negf %57 : vector<1x128xf32>
    %59 = math.exp %58 : vector<1x128xf32>
    %cst_25 = arith.constant 1.000000e+00 : f32
    %60 = vector.broadcast %cst_25 : f32 to vector<1x128xf32>
    %61 = arith.addf %60, %59 : vector<1x128xf32>
    %62 = arith.divf %60, %61 : vector<1x128xf32>
    %63 = math.tanh %57 : vector<1x128xf32>
    %64 = vector.extract_strided_slice %62 {offsets = [0, 0], sizes = [1, 32], strides = [1, 1]} : vector<1x128xf32> to vector<1x32xf32>
    %65 = vector.extract_strided_slice %62 {offsets = [0, 32], sizes = [1, 32], strides = [1, 1]} : vector<1x128xf32> to vector<1x32xf32>
    %66 = vector.extract_strided_slice %63 {offsets = [0, 64], sizes = [1, 32], strides = [1, 1]} : vector<1x128xf32> to vector<1x32xf32>
    %67 = vector.extract_strided_slice %62 {offsets = [0, 96], sizes = [1, 32], strides = [1, 1]} : vector<1x128xf32> to vector<1x32xf32>
    %68 = arith.mulf %65, %48 : vector<1x32xf32>
    %69 = arith.mulf %64, %66 : vector<1x32xf32>
    %70 = arith.addf %68, %69 : vector<1x32xf32>
    %71 = math.tanh %70 : vector<1x32xf32>
    %72 = arith.mulf %67, %71 : vector<1x32xf32>
    %73 = arith.index_cast %c2_i32 : i32 to index
    %c0_26 = arith.constant 0 : index
    %74 = vector.load %arg8[%73, %c0_26] : memref<8x32xf32, #tpu.memory_space<vmem>>, vector<1x32xf32>
    tpu.vector_store %arg8[%73, %c0_26], %72 {strides = array<i32>} : memref<8x32xf32, #tpu.memory_space<vmem>>, vector<1x32xf32>,
    %c3_i32 = arith.constant 3 : i32
    %75 = arith.index_cast %c3_i32 : i32 to index
    %c0_27 = arith.constant 0 : index
    %76 = vector.load %arg7[%75, %c0_27] : memref<8x128xf32, #tpu.memory_space<vmem>>, vector<1x128xf32>
    %c0_28 = arith.constant 0 : index
    %c0_29 = arith.constant 0 : index
    %77 = vector.load %arg2[%c0_28, %c0_29] : memref<32x128xf32, #tpu.memory_space<vmem>>, vector<32x128xf32>
    %cst_30 = arith.constant dense<0.000000e+00> : vector<1x128xf32>
    %78 = tpu.matmul %72, %77, %cst_30 {dimension_numbers = #tpu.dot_dimension_numbers<[1], [0], [0], [1], [0, 0, 1, 1], [], []>} : vector<1x32xf32>, vector<32x128xf32>, vector<1x128xf32> -> vector<1x128xf32>
    %79 = arith.addf %76, %78 : vector<1x128xf32>
    %80 = arith.negf %79 : vector<1x128xf32>
    %81 = math.exp %80 : vector<1x128xf32>
    %cst_31 = arith.constant 1.000000e+00 : f32
    %82 = vector.broadcast %cst_31 : f32 to vector<1x128xf32>
    %83 = arith.addf %82, %81 : vector<1x128xf32>
    %84 = arith.divf %82, %83 : vector<1x128xf32>
    %85 = math.tanh %79 : vector<1x128xf32>
    %86 = vector.extract_strided_slice %84 {offsets = [0, 0], sizes = [1, 32], strides = [1, 1]} : vector<1x128xf32> to vector<1x32xf32>
    %87 = vector.extract_strided_slice %84 {offsets = [0, 32], sizes = [1, 32], strides = [1, 1]} : vector<1x128xf32> to vector<1x32xf32>
    %88 = vector.extract_strided_slice %85 {offsets = [0, 64], sizes = [1, 32], strides = [1, 1]} : vector<1x128xf32> to vector<1x32xf32>
    %89 = vector.extract_strided_slice %84 {offsets = [0, 96], sizes = [1, 32], strides = [1, 1]} : vector<1x128xf32> to vector<1x32xf32>
    %90 = arith.mulf %87, %70 : vector<1x32xf32>
    %91 = arith.mulf %86, %88 : vector<1x32xf32>
    %92 = arith.addf %90, %91 : vector<1x32xf32>
    %93 = math.tanh %92 : vector<1x32xf32>
    %94 = arith.mulf %89, %93 : vector<1x32xf32>
    %95 = arith.index_cast %c3_i32 : i32 to index
    %c0_32 = arith.constant 0 : index
    %96 = vector.load %arg8[%95, %c0_32] : memref<8x32xf32, #tpu.memory_space<vmem>>, vector<1x32xf32>
    tpu.vector_store %arg8[%95, %c0_32], %94 {strides = array<i32>} : memref<8x32xf32, #tpu.memory_space<vmem>>, vector<1x32xf32>,
    %c4_i32 = arith.constant 4 : i32
    %97 = arith.index_cast %c4_i32 : i32 to index
    %c0_33 = arith.constant 0 : index
    %98 = vector.load %arg7[%97, %c0_33] : memref<8x128xf32, #tpu.memory_space<vmem>>, vector<1x128xf32>
    %c0_34 = arith.constant 0 : index
    %c0_35 = arith.constant 0 : index
    %99 = vector.load %arg2[%c0_34, %c0_35] : memref<32x128xf32, #tpu.memory_space<vmem>>, vector<32x128xf32>
    %cst_36 = arith.constant dense<0.000000e+00> : vector<1x128xf32>
    %100 = tpu.matmul %94, %99, %cst_36 {dimension_numbers = #tpu.dot_dimension_numbers<[1], [0], [0], [1], [0, 0, 1, 1], [], []>} : vector<1x32xf32>, vector<32x128xf32>, vector<1x128xf32> -> vector<1x128xf32>
    %101 = arith.addf %98, %100 : vector<1x128xf32>
    %102 = arith.negf %101 : vector<1x128xf32>
    %103 = math.exp %102 : vector<1x128xf32>
    %cst_37 = arith.constant 1.000000e+00 : f32
    %104 = vector.broadcast %cst_37 : f32 to vector<1x128xf32>
    %105 = arith.addf %104, %103 : vector<1x128xf32>
    %106 = arith.divf %104, %105 : vector<1x128xf32>
    %107 = math.tanh %101 : vector<1x128xf32>
    %108 = vector.extract_strided_slice %106 {offsets = [0, 0], sizes = [1, 32], strides = [1, 1]} : vector<1x128xf32> to vector<1x32xf32>
    %109 = vector.extract_strided_slice %106 {offsets = [0, 32], sizes = [1, 32], strides = [1, 1]} : vector<1x128xf32> to vector<1x32xf32>
    %110 = vector.extract_strided_slice %107 {offsets = [0, 64], sizes = [1, 32], strides = [1, 1]} : vector<1x128xf32> to vector<1x32xf32>
    %111 = vector.extract_strided_slice %106 {offsets = [0, 96], sizes = [1, 32], strides = [1, 1]} : vector<1x128xf32> to vector<1x32xf32>
    %112 = arith.mulf %109, %92 : vector<1x32xf32>
    %113 = arith.mulf %108, %110 : vector<1x32xf32>
    %114 = arith.addf %112, %113 : vector<1x32xf32>
    %115 = math.tanh %114 : vector<1x32xf32>
    %116 = arith.mulf %111, %115 : vector<1x32xf32>
    %117 = arith.index_cast %c4_i32 : i32 to index
    %c0_38 = arith.constant 0 : index
    %118 = vector.load %arg8[%117, %c0_38] : memref<8x32xf32, #tpu.memory_space<vmem>>, vector<1x32xf32>
    tpu.vector_store %arg8[%117, %c0_38], %116 {strides = array<i32>} : memref<8x32xf32, #tpu.memory_space<vmem>>, vector<1x32xf32>,
    %c5_i32 = arith.constant 5 : i32
    %119 = arith.index_cast %c5_i32 : i32 to index
    %c0_39 = arith.constant 0 : index
    %120 = vector.load %arg7[%119, %c0_39] : memref<8x128xf32, #tpu.memory_space<vmem>>, vector<1x128xf32>
    %c0_40 = arith.constant 0 : index
    %c0_41 = arith.constant 0 : index
    %121 = vector.load %arg2[%c0_40, %c0_41] : memref<32x128xf32, #tpu.memory_space<vmem>>, vector<32x128xf32>
    %cst_42 = arith.constant dense<0.000000e+00> : vector<1x128xf32>
    %122 = tpu.matmul %116, %121, %cst_42 {dimension_numbers = #tpu.dot_dimension_numbers<[1], [0], [0], [1], [0, 0, 1, 1], [], []>} : vector<1x32xf32>, vector<32x128xf32>, vector<1x128xf32> -> vector<1x128xf32>
    %123 = arith.addf %120, %122 : vector<1x128xf32>
    %124 = arith.negf %123 : vector<1x128xf32>
    %125 = math.exp %124 : vector<1x128xf32>
    %cst_43 = arith.constant 1.000000e+00 : f32
    %126 = vector.broadcast %cst_43 : f32 to vector<1x128xf32>
    %127 = arith.addf %126, %125 : vector<1x128xf32>
    %128 = arith.divf %126, %127 : vector<1x128xf32>
    %129 = math.tanh %123 : vector<1x128xf32>
    %130 = vector.extract_strided_slice %128 {offsets = [0, 0], sizes = [1, 32], strides = [1, 1]} : vector<1x128xf32> to vector<1x32xf32>
    %131 = vector.extract_strided_slice %128 {offsets = [0, 32], sizes = [1, 32], strides = [1, 1]} : vector<1x128xf32> to vector<1x32xf32>
    %132 = vector.extract_strided_slice %129 {offsets = [0, 64], sizes = [1, 32], strides = [1, 1]} : vector<1x128xf32> to vector<1x32xf32>
    %133 = vector.extract_strided_slice %128 {offsets = [0, 96], sizes = [1, 32], strides = [1, 1]} : vector<1x128xf32> to vector<1x32xf32>
    %134 = arith.mulf %131, %114 : vector<1x32xf32>
    %135 = arith.mulf %130, %132 : vector<1x32xf32>
    %136 = arith.addf %134, %135 : vector<1x32xf32>
    %137 = math.tanh %136 : vector<1x32xf32>
    %138 = arith.mulf %133, %137 : vector<1x32xf32>
    %139 = arith.index_cast %c5_i32 : i32 to index
    %c0_44 = arith.constant 0 : index
    %140 = vector.load %arg8[%139, %c0_44] : memref<8x32xf32, #tpu.memory_space<vmem>>, vector<1x32xf32>
    tpu.vector_store %arg8[%139, %c0_44], %138 {strides = array<i32>} : memref<8x32xf32, #tpu.memory_space<vmem>>, vector<1x32xf32>,
    %c6_i32 = arith.constant 6 : i32
    %141 = arith.index_cast %c6_i32 : i32 to index
    %c0_45 = arith.constant 0 : index
    %142 = vector.load %arg7[%141, %c0_45] : memref<8x128xf32, #tpu.memory_space<vmem>>, vector<1x128xf32>
    %c0_46 = arith.constant 0 : index
    %c0_47 = arith.constant 0 : index
    %143 = vector.load %arg2[%c0_46, %c0_47] : memref<32x128xf32, #tpu.memory_space<vmem>>, vector<32x128xf32>
    %cst_48 = arith.constant dense<0.000000e+00> : vector<1x128xf32>
    %144 = tpu.matmul %138, %143, %cst_48 {dimension_numbers = #tpu.dot_dimension_numbers<[1], [0], [0], [1], [0, 0, 1, 1], [], []>} : vector<1x32xf32>, vector<32x128xf32>, vector<1x128xf32> -> vector<1x128xf32>
    %145 = arith.addf %142, %144 : vector<1x128xf32>
    %146 = arith.negf %145 : vector<1x128xf32>
    %147 = math.exp %146 : vector<1x128xf32>
    %cst_49 = arith.constant 1.000000e+00 : f32
    %148 = vector.broadcast %cst_49 : f32 to vector<1x128xf32>
    %149 = arith.addf %148, %147 : vector<1x128xf32>
    %150 = arith.divf %148, %149 : vector<1x128xf32>
    %151 = math.tanh %145 : vector<1x128xf32>
    %152 = vector.extract_strided_slice %150 {offsets = [0, 0], sizes = [1, 32], strides = [1, 1]} : vector<1x128xf32> to vector<1x32xf32>
    %153 = vector.extract_strided_slice %150 {offsets = [0, 32], sizes = [1, 32], strides = [1, 1]} : vector<1x128xf32> to vector<1x32xf32>
    %154 = vector.extract_strided_slice %151 {offsets = [0, 64], sizes = [1, 32], strides = [1, 1]} : vector<1x128xf32> to vector<1x32xf32>
    %155 = vector.extract_strided_slice %150 {offsets = [0, 96], sizes = [1, 32], strides = [1, 1]} : vector<1x128xf32> to vector<1x32xf32>
    %156 = arith.mulf %153, %136 : vector<1x32xf32>
    %157 = arith.mulf %152, %154 : vector<1x32xf32>
    %158 = arith.addf %156, %157 : vector<1x32xf32>
    %159 = math.tanh %158 : vector<1x32xf32>
    %160 = arith.mulf %155, %159 : vector<1x32xf32>
    %161 = arith.index_cast %c6_i32 : i32 to index
    %c0_50 = arith.constant 0 : index
    %162 = vector.load %arg8[%161, %c0_50] : memref<8x32xf32, #tpu.memory_space<vmem>>, vector<1x32xf32>
    tpu.vector_store %arg8[%161, %c0_50], %160 {strides = array<i32>} : memref<8x32xf32, #tpu.memory_space<vmem>>, vector<1x32xf32>,
    %c7_i32 = arith.constant 7 : i32
    %163 = arith.index_cast %c7_i32 : i32 to index
    %c0_51 = arith.constant 0 : index
    %164 = vector.load %arg7[%163, %c0_51] : memref<8x128xf32, #tpu.memory_space<vmem>>, vector<1x128xf32>
    %c0_52 = arith.constant 0 : index
    %c0_53 = arith.constant 0 : index
    %165 = vector.load %arg2[%c0_52, %c0_53] : memref<32x128xf32, #tpu.memory_space<vmem>>, vector<32x128xf32>
    %cst_54 = arith.constant dense<0.000000e+00> : vector<1x128xf32>
    %166 = tpu.matmul %160, %165, %cst_54 {dimension_numbers = #tpu.dot_dimension_numbers<[1], [0], [0], [1], [0, 0, 1, 1], [], []>} : vector<1x32xf32>, vector<32x128xf32>, vector<1x128xf32> -> vector<1x128xf32>
    %167 = arith.addf %164, %166 : vector<1x128xf32>
    %168 = arith.negf %167 : vector<1x128xf32>
    %169 = math.exp %168 : vector<1x128xf32>
    %cst_55 = arith.constant 1.000000e+00 : f32
    %170 = vector.broadcast %cst_55 : f32 to vector<1x128xf32>
    %171 = arith.addf %170, %169 : vector<1x128xf32>
    %172 = arith.divf %170, %171 : vector<1x128xf32>
    %173 = math.tanh %167 : vector<1x128xf32>
    %174 = vector.extract_strided_slice %172 {offsets = [0, 0], sizes = [1, 32], strides = [1, 1]} : vector<1x128xf32> to vector<1x32xf32>
    %175 = vector.extract_strided_slice %172 {offsets = [0, 32], sizes = [1, 32], strides = [1, 1]} : vector<1x128xf32> to vector<1x32xf32>
    %176 = vector.extract_strided_slice %173 {offsets = [0, 64], sizes = [1, 32], strides = [1, 1]} : vector<1x128xf32> to vector<1x32xf32>
    %177 = vector.extract_strided_slice %172 {offsets = [0, 96], sizes = [1, 32], strides = [1, 1]} : vector<1x128xf32> to vector<1x32xf32>
    %178 = arith.mulf %175, %158 : vector<1x32xf32>
    %179 = arith.mulf %174, %176 : vector<1x32xf32>
    %180 = arith.addf %178, %179 : vector<1x32xf32>
    %181 = math.tanh %180 : vector<1x32xf32>
    %182 = arith.mulf %177, %181 : vector<1x32xf32>
    %183 = arith.index_cast %c7_i32 : i32 to index
    %c0_56 = arith.constant 0 : index
    %184 = vector.load %arg8[%183, %c0_56] : memref<8x32xf32, #tpu.memory_space<vmem>>, vector<1x32xf32>
    tpu.vector_store %arg8[%183, %c0_56], %182 {strides = array<i32>} : memref<8x32xf32, #tpu.memory_space<vmem>>, vector<1x32xf32>,
    %c8_i32 = arith.constant 8 : i32
    %c0_57 = arith.constant 0 : index
    %c0_58 = arith.constant 0 : index
    %185 = vector.load %arg8[%c0_57, %c0_58] : memref<8x32xf32, #tpu.memory_space<vmem>>, vector<8x32xf32>
    %c0_59 = arith.constant 0 : index
    %c0_60 = arith.constant 0 : index
    %186 = vector.load %arg4[%c0_59, %c0_60] : memref<32x8xf32, #tpu.memory_space<vmem>>, vector<32x8xf32>
    %cst_61 = arith.constant dense<0.000000e+00> : vector<8x8xf32>
    %187 = tpu.matmul %185, %186, %cst_61 {dimension_numbers = #tpu.dot_dimension_numbers<[1], [0], [0], [1], [0, 0, 1, 1], [], []>} : vector<8x32xf32>, vector<32x8xf32>, vector<8x8xf32> -> vector<8x8xf32>
    %c0_62 = arith.constant 0 : index
    %c0_63 = arith.constant 0 : index
    %188 = vector.load %arg5[%c0_62, %c0_63] : memref<1x8xf32, #tpu.memory_space<vmem>>, vector<1x8xf32>
    %189 = vector.broadcast %188 : vector<1x8xf32> to vector<8x8xf32>
    %190 = arith.addf %187, %189 : vector<8x8xf32>
    %c0_64 = arith.constant 0 : index
    %c0_65 = arith.constant 0 : index
    %191 = vector.load %arg6[%c0_64, %c0_65] : memref<8x8xf32, #tpu.memory_space<vmem>>, vector<8x8xf32>
    tpu.vector_store %arg6[%c0_64, %c0_65], %190 {strides = array<i32>} : memref<8x8xf32, #tpu.memory_space<vmem>>, vector<8x8xf32>,
    return
  }
}

</mosaic_0001>

<bundles_post_ra>
// kernel: lstm_tagger_forward.1
= control target key start
LH: loop header
LB: loop body
LE: loop exit
PB: predicated region body
PF: predicated region fallthrough
CT: control target
= control target key end

     0   :  { %s919_s0 = inlined_call_operand.vmem [shape: f32[8,32], index: 0, kind: input, shape index: {}]   ;;  %s920_s1 = inlined_call_operand.vmem [shape: f32[32,128], index: 1, kind: input, shape index: {}]   ;;  %s921_s2 = inlined_call_operand.vmem [shape: f32[32,128], index: 2, kind: input, shape index: {}]   ;;  %s922_s3 = inlined_call_operand.vmem [shape: f32[1,128], index: 3, kind: input, shape index: {}]   ;;  %s923_s4 = inlined_call_operand.vmem [shape: f32[32,8], index: 4, kind: input, shape index: {}]   ;;  %s924_s5 = inlined_call_operand.vmem [shape: f32[1,8], index: 5, kind: input, shape index: {}]   ;;  %s925_s6 = inlined_call_operand.hbm [shape: f32[8,8], index: 6, kind: output, shape index: {}]  }
   0x1   :  { %v28_v0 = vld [vmem:[%s920_s1 + $0x18] sm:$0xff]  ;;  %v27_v1 = vld [vmem:[%s920_s1 + $0x10] sm:$0xff]  ;;  %v26_v3 = vld [vmem:[%s920_s1 + $0x8] sm:$0xff] }
   0x2   :  { %49 = vmatpush.msra.mxu0 %v28_v0  ;;  %v62_v2 = vld [vmem:[%s921_s2 + $0x18] sm:$0xff]  ;;  %v61_v4 = vld [vmem:[%s921_s2 + $0x10] sm:$0xff]  ;;  %v60_v5 = vld [vmem:[%s921_s2 + $0x8] sm:$0xff] }
   0x3   :  { %78 = vmatpush.msra.mxu1 %v62_v2  ;;  %149 = vmatpush.msra.mxu2 %v62_v2  ;;  %v25_v6 = vld [vmem:[%s920_s1] sm:$0xff] }
   0x4   :  { %50 = vmatpush.msra.mxu0 %v27_v1  ;;  %219 = vmatpush.msra.mxu3 %v62_v2 }
   0x5   :  { %79 = vmatpush.msra.mxu1 %v61_v4  ;;  %150 = vmatpush.msra.mxu2 %v61_v4 }
   0x6   :  { %11 = vsyncpa [#allocation5], 0  ;;  %51 = vmatpush.msra.mxu0 %v26_v3  ;;  %v24_v7 = vld [vmem:[%s919_s0] sm:$0xff]  ;;  %vm33_vm0 = vcmask 261120   ;;  %220 = vmatpush.msra.mxu3 %v61_v4  ;;  %v783_v9 = vmov 0.0   ;;  %vm128_vm5 = vcmask 253952  }
   0x7   :  { %v59_v8 = vld [vmem:[%s921_s2] sm:$0xff]  ;;  %80 = vmatpush.msra.mxu1 %v60_v5  ;;  %151 = vmatpush.msra.mxu2 %v60_v5  ;;  %s784_s2 = smov 64   ;;  %s786_s25 = smov [#allocation4]  }
   0x8   :  { %52 = vmatpush.msra.mxu0 %v25_v6  ;;  %221 = vmatpush.msra.mxu3 %v60_v5  ;;  %v691_v10 = vld [vmem:[%s922_s3] ss:$0 sm:$0xff]  ;;  %s785_s3 = smov 32   ;;  %s659_s26 = sshll.u32 %s786_s25, 4  ;;  %s660_s26 = int_to_ptr.vmem [resolvable:$true] %s659_s26 }
   0x9   :  { %670 = vmatmul.msk.f32.vlgmr.msra.gmra.mxu0 %vm33_vm0, %v24_v7  ;;  %81 = vmatpush.msra.mxu1 %v59_v8  ;;  %s661_s29 = sshll.u32 %s925_s6, 4  ;;  %s662_s29 = int_to_ptr.hbm [resolvable:$true] %s661_s29 }
   0xa   :  { %82 = vmatmul.f32.vlgmr.msra.gmra.mxu1 %v783_v9  ;;  %152 = vmatpush.msra.mxu2 %v59_v8 }
   0xb   :  { %222 = vmatpush.msra.mxu3 %v59_v8  ;;  %289 = vmatpush.msrb.mxu0 %v62_v2 }
   0xc   :  { %359 = vmatpush.msrb.mxu1 %v62_v2  ;;  %429 = vmatpush.msrb.mxu2 %v62_v2 }
   0xd   :  { %290 = vmatpush.msrb.mxu0 %v61_v4  ;;  %499 = vmatpush.msrb.mxu3 %v62_v2 }
   0xe   :  { %360 = vmatpush.msrb.mxu1 %v61_v4  ;;  %430 = vmatpush.msrb.mxu2 %v61_v4 }
   0xf   :  { %291 = vmatpush.msrb.mxu0 %v60_v5  ;;  %500 = vmatpush.msrb.mxu3 %v61_v4 }
  0x10   :  { %361 = vmatpush.msrb.mxu1 %v60_v5  ;;  %431 = vmatpush.msrb.mxu2 %v60_v5 }
  0x11   :  { %292 = vmatpush.msrb.mxu0 %v59_v8  ;;  %501 = vmatpush.msrb.mxu3 %v60_v5 }
  0x12   :  { %362 = vmatpush.msrb.mxu1 %v59_v8  ;;  %432 = vmatpush.msrb.mxu2 %v59_v8 }
  0x13   :  { %502 = vmatpush.msrb.mxu3 %v59_v8  ;;  %569 = vmatpush.msra.mxu0 %v62_v2 }
  0x15   :  { %570 = vmatpush.msra.mxu0 %v61_v4 }
  0x17   :  { %571 = vmatpush.msra.mxu0 %v60_v5 }
  0x19   :  { %572 = vmatpush.msra.mxu0 %v59_v8 }
  0x86   :  { %v54_v11 = vpop.f32.mrf.mxu0 }
  0x87   :  { %v55_v12 = vadd.f32 %v691_v10, %v54_v11  ;;  %v83_v13 = vpop.f32.mrf.mxu1 }
  0x89   :  { %57 = vst [vmem:[#allocation2] sm:$0xff] %v55_v12 }
  0x90   :  { %v58_v14 = vld [vmem:[#allocation2] sm:$0x1]  ;;  %v130_v39 = vld [vmem:[#allocation2 + $0x1] sm:$0x1]  ;;  %v200_v1 = vld [vmem:[#allocation2 + $0x2] sm:$0x1] }
  0x91   :  { %v86_v15 = vadd.f32 %v83_v13, %v58_v14 }
  0x93   :  { %693 = vtanh.f32 %v86_v15  ;;  %v671_v17 = vmul.f32 -1.442695, %v86_v15 }
  0x95   :  { %695 = vpow2.f32 %v671_v17 }
  0x99   :  { %v694_v16 = vpop.eup %693 }
  0x9a   :  { %109 = vrot.lane.b32.xlu0 %v694_v16, %s784_s2 }
  0x9b   :  { %v696_v18 = vpop.eup %695 }
  0x9c   :  { %v90_v19 = vadd.f32 1.0, %v696_v18 }
  0x9e   :  { %697 = vrcp.f32 %v90_v19  ;;  %v102_v25 = vand.u32 2147483648, %v90_v19  ;;  %vm96_vm2 = vweird.f32 %v90_v19  ;;  %v100_v26 = vand.u32 2147483647, %v90_v19 }
  0xa0   :  { %v103_v28 = vor.u32 1.1754944e-38, %v102_v25  ;;  %vm101_vm4 = vcmp.eq.f32.partialorder %v100_v26, 8.507059e+37 }
  0xa4   :  { %v698_v20 = vpop.eup %697 }
  0xa5   :  { %v92_v21 = vmul.f32 %v698_v20, %v90_v19  ;;  %vm97_vm1 = vweird.f32 %v698_v20 }
  0xa6   :  { %vm98_vm3 = vmor %vm96_vm2, %vm97_vm1 }
  0xa7   :  { %v93_v22 = vsub.f32 1.0, %v92_v21 }
  0xa9   :  { %v94_v23 = vmul.f32 %v698_v20, %v93_v22 }
  0xab   :  { %v95_v24 = vadd.f32 %v698_v20, %v94_v23 }
  0xad   :  { %v99_v27 = vsel %vm98_vm3, %v698_v20, %v95_v24 }
  0xae   :  { %v104_v30 = vsel %vm101_vm4, %v103_v28, %v99_v27  ;;  %v270_v27 = vld [vmem:[#allocation2 + $0x3] sm:$0x1] }
  0xaf   :  { %v107_v32 = vmul.f32 0.0, %v104_v30 }
 0x10c   :  { %v110_v29 = vpop.permute.xlu0 %109 }
 0x10d   :  { %v112_v31 = vmul.f32 %v110_v29, %v104_v30 }
 0x10f   :  { %114 = vrot.lane.b32.xlu0 %v112_v31, %s785_s3 }
 0x181   :  { %v115_v33 = vpop.permute.xlu0 %114 }
 0x182   :  { %v117_v34 = vadd.f32 %v115_v33, %v107_v32 }
 0x184   :  { %699 = vtanh.f32 %v117_v34 }
 0x18a   :  { %v700_v35 = vpop.eup %699 }
 0x18b   :  { %120 = vrot.lane.b32.xlu1 %v700_v35, %s784_s2 }
 0x1fd   :  { %v121_v36 = vpop.permute.xlu1 %120 }
 0x1fe   :  { %v123_v37 = vmul.f32 %v121_v36, %v104_v30 }
 0x200   :  { %125 = vrot.lane.b32.xlu1 %v123_v37, %s785_s3 }
 0x272   :  { %v126_v38 = vpop.permute.xlu1 %125 }
 0x273   :  { %129 = vst.msk [vmem:[#allocation3] sm:$0x1] %vm128_vm5, %v126_v38  ;;  %672 = vmatmul.msk.f32.vlgmr.msra.gmra.mxu2 %vm33_vm0, %v126_v38 }
 0x2f6   :  { %v154_v40 = vpop.f32.mrf.mxu2 }
 0x2f7   :  { %v157_v41 = vadd.f32 %v154_v40, %v130_v39 }
 0x2f9   :  { %701 = vtanh.f32 %v157_v41  ;;  %v673_v43 = vmul.f32 -1.442695, %v157_v41 }
 0x2fb   :  { %703 = vpow2.f32 %v673_v43 }
 0x2ff   :  { %v702_v42 = vpop.eup %701 }
 0x300   :  { %180 = vrot.lane.b32.xlu2 %v702_v42, %s784_s2 }
 0x301   :  { %v704_v44 = vpop.eup %703 }
 0x302   :  { %v161_v45 = vadd.f32 1.0, %v704_v44 }
 0x304   :  { %705 = vrcp.f32 %v161_v45  ;;  %v173_v51 = vand.u32 2147483648, %v161_v45  ;;  %vm167_vm7 = vweird.f32 %v161_v45  ;;  %v171_v52 = vand.u32 2147483647, %v161_v45 }
 0x306   :  { %v174_v54 = vor.u32 1.1754944e-38, %v173_v51  ;;  %vm172_vm9 = vcmp.eq.f32.partialorder %v171_v52, 8.507059e+37 }
 0x30a   :  { %v706_v46 = vpop.eup %705 }
 0x30b   :  { %v163_v47 = vmul.f32 %v706_v46, %v161_v45  ;;  %vm168_vm6 = vweird.f32 %v706_v46 }
 0x30c   :  { %vm169_vm8 = vmor %vm167_vm7, %vm168_vm6 }
 0x30d   :  { %v164_v48 = vsub.f32 1.0, %v163_v47 }
 0x30f   :  { %v165_v49 = vmul.f32 %v706_v46, %v164_v48 }
 0x311   :  { %v166_v50 = vadd.f32 %v706_v46, %v165_v49 }
 0x313   :  { %v170_v53 = vsel %vm169_vm8, %v706_v46, %v166_v50 }
 0x314   :  { %v175_v56 = vsel %vm172_vm9, %v174_v54, %v170_v53  ;;  %v340_v53 = vld [vmem:[#allocation2 + $0x4] sm:$0x1] }
 0x315   :  { %v178_v58 = vmul.f32 %v175_v56, %v117_v34 }
 0x35a   :  { %v181_v55 = vpop.permute.xlu2 %180 }
 0x35b   :  { %v183_v57 = vmul.f32 %v181_v55, %v175_v56 }
 0x35d   :  { %185 = vrot.lane.b32.xlu2 %v183_v57, %s785_s3 }
 0x3b7   :  { %v186_v59 = vpop.permute.xlu2 %185 }
 0x3b8   :  { %v188_v60 = vadd.f32 %v186_v59, %v178_v58 }
 0x3ba   :  { %707 = vtanh.f32 %v188_v60 }
 0x3c0   :  { %v708_v61 = vpop.eup %707 }
 0x3c1   :  { %191 = vrot.lane.b32.xlu0 %v708_v61, %s784_s2 }
 0x433   :  { %v192_v62 = vpop.permute.xlu0 %191 }
 0x434   :  { %v194_v63 = vmul.f32 %v192_v62, %v175_v56 }
 0x436   :  { %196 = vrot.lane.b32.xlu1 %v194_v63, %s785_s3 }
 0x4a8   :  { %v197_v0 = vpop.permute.xlu1 %196 }
 0x4a9   :  { %199 = vst.msk [vmem:[#allocation3 + $0x1] sm:$0x1] %vm128_vm5, %v197_v0  ;;  %674 = vmatmul.msk.f32.vlgmr.msra.gmra.mxu3 %vm33_vm0, %v197_v0 }
 0x52c   :  { %v224_v2 = vpop.f32.mrf.mxu3 }
 0x52d   :  { %v227_v3 = vadd.f32 %v224_v2, %v200_v1 }
 0x52f   :  { %709 = vtanh.f32 %v227_v3  ;;  %v675_v5 = vmul.f32 -1.442695, %v227_v3 }
 0x531   :  { %711 = vpow2.f32 %v675_v5 }
 0x535   :  { %v710_v4 = vpop.eup %709 }
 0x536   :  { %250 = vrot.lane.b32.xlu2 %v710_v4, %s784_s2 }
 0x537   :  { %v712_v6 = vpop.eup %711 }
 0x538   :  { %v231_v7 = vadd.f32 1.0, %v712_v6 }
 0x53a   :  { %713 = vrcp.f32 %v231_v7  ;;  %v243_v13 = vand.u32 2147483648, %v231_v7  ;;  %vm237_vm11 = vweird.f32 %v231_v7  ;;  %v241_v14 = vand.u32 2147483647, %v231_v7 }
 0x53c   :  { %v244_v16 = vor.u32 1.1754944e-38, %v243_v13  ;;  %vm242_vm13 = vcmp.eq.f32.partialorder %v241_v14, 8.507059e+37 }
 0x540   :  { %v714_v8 = vpop.eup %713 }
 0x541   :  { %v233_v9 = vmul.f32 %v714_v8, %v231_v7  ;;  %vm238_vm10 = vweird.f32 %v714_v8 }
 0x542   :  { %vm239_vm12 = vmor %vm237_vm11, %vm238_vm10 }
 0x543   :  { %v234_v10 = vsub.f32 1.0, %v233_v9 }
 0x545   :  { %v235_v11 = vmul.f32 %v714_v8, %v234_v10 }
 0x547   :  { %v236_v12 = vadd.f32 %v714_v8, %v235_v11 }
 0x549   :  { %v240_v15 = vsel %vm239_vm12, %v714_v8, %v236_v12 }
 0x54a   :  { %v245_v18 = vsel %vm242_vm13, %v244_v16, %v240_v15  ;;  %v410_v15 = vld [vmem:[#allocation2 + $0x5] sm:$0x1] }
 0x54b   :  { %v248_v20 = vmul.f32 %v245_v18, %v188_v60 }
 0x590   :  { %v251_v17 = vpop.permute.xlu2 %250 }
 0x591   :  { %v253_v19 = vmul.f32 %v251_v17, %v245_v18 }
 0x593   :  { %255 = vrot.lane.b32.xlu0 %v253_v19, %s785_s3 }
 0x605   :  { %v256_v21 = vpop.permute.xlu0 %255 }
 0x606   :  { %v258_v22 = vadd.f32 %v256_v21, %v248_v20 }
 0x608   :  { %715 = vtanh.f32 %v258_v22 }
 0x60e   :  { %v716_v23 = vpop.eup %715 }
 0x60f   :  { %261 = vrot.lane.b32.xlu1 %v716_v23, %s784_s2 }
 0x681   :  { %v262_v24 = vpop.permute.xlu1 %261 }
 0x682   :  { %v264_v25 = vmul.f32 %v262_v24, %v245_v18 }
 0x684   :  { %266 = vrot.lane.b32.xlu2 %v264_v25, %s785_s3 }
 0x6de   :  { %v267_v26 = vpop.permute.xlu2 %266 }
 0x6df   :  { %269 = vst.msk [vmem:[#allocation3 + $0x2] sm:$0x1] %vm128_vm5, %v267_v26  ;;  %676 = vmatmul.msk.f32.vlgmr.msrb.gmra.mxu0 %vm33_vm0, %v267_v26 }
 0x75c   :  { %v294_v28 = vpop.f32.mrf.mxu0 }
 0x75d   :  { %v297_v29 = vadd.f32 %v294_v28, %v270_v27 }
 0x75f   :  { %717 = vtanh.f32 %v297_v29  ;;  %v677_v31 = vmul.f32 -1.442695, %v297_v29 }
 0x761   :  { %719 = vpow2.f32 %v677_v31 }
 0x765   :  { %v718_v30 = vpop.eup %717 }
 0x766   :  { %320 = vrot.lane.b32.xlu0 %v718_v30, %s784_s2 }
 0x767   :  { %v720_v32 = vpop.eup %719 }
 0x768   :  { %v301_v33 = vadd.f32 1.0, %v720_v32 }
 0x76a   :  { %721 = vrcp.f32 %v301_v33  ;;  %v313_v39 = vand.u32 2147483648, %v301_v33  ;;  %vm307_vm15 = vweird.f32 %v301_v33  ;;  %v311_v40 = vand.u32 2147483647, %v301_v33 }
 0x76c   :  { %v314_v42 = vor.u32 1.1754944e-38, %v313_v39  ;;  %vm312_vm2 = vcmp.eq.f32.partialorder %v311_v40, 8.507059e+37 }
 0x770   :  { %v722_v34 = vpop.eup %721 }
 0x771   :  { %v303_v35 = vmul.f32 %v722_v34, %v301_v33  ;;  %vm308_vm14 = vweird.f32 %v722_v34 }
 0x772   :  { %vm309_vm1 = vmor %vm307_vm15, %vm308_vm14 }
 0x773   :  { %v304_v36 = vsub.f32 1.0, %v303_v35 }
 0x775   :  { %v305_v37 = vmul.f32 %v722_v34, %v304_v36 }
 0x777   :  { %v306_v38 = vadd.f32 %v722_v34, %v305_v37 }
 0x779   :  { %v310_v41 = vsel %vm309_vm1, %v722_v34, %v306_v38 }
 0x77a   :  { %v315_v44 = vsel %vm312_vm2, %v314_v42, %v310_v41  ;;  %v480_v41 = vld [vmem:[#allocation2 + $0x6] sm:$0x1] }
 0x77b   :  { %v318_v46 = vmul.f32 %v315_v44, %v258_v22 }
 0x7d8   :  { %v321_v43 = vpop.permute.xlu0 %320 }
 0x7d9   :  { %v323_v45 = vmul.f32 %v321_v43, %v315_v44 }
 0x7db   :  { %325 = vrot.lane.b32.xlu1 %v323_v45, %s785_s3 }
 0x84d   :  { %v326_v47 = vpop.permute.xlu1 %325 }
 0x84e   :  { %v328_v48 = vadd.f32 %v326_v47, %v318_v46 }
 0x850   :  { %723 = vtanh.f32 %v328_v48 }
 0x856   :  { %v724_v49 = vpop.eup %723 }
 0x857   :  { %331 = vrot.lane.b32.xlu2 %v724_v49, %s784_s2 }
 0x8b1   :  { %v332_v50 = vpop.permute.xlu2 %331 }
 0x8b2   :  { %v334_v51 = vmul.f32 %v332_v50, %v315_v44 }
 0x8b4   :  { %336 = vrot.lane.b32.xlu0 %v334_v51, %s785_s3 }
 0x926   :  { %v337_v52 = vpop.permute.xlu0 %336 }
 0x927   :  { %339 = vst.msk [vmem:[#allocation3 + $0x3] sm:$0x1] %vm128_vm5, %v337_v52  ;;  %678 = vmatmul.msk.f32.vlgmr.msrb.gmra.mxu1 %vm33_vm0, %v337_v52 }
 0x9a4   :  { %v364_v54 = vpop.f32.mrf.mxu1 }
 0x9a5   :  { %v367_v55 = vadd.f32 %v364_v54, %v340_v53 }
 0x9a7   :  { %725 = vtanh.f32 %v367_v55  ;;  %v679_v57 = vmul.f32 -1.442695, %v367_v55 }
 0x9a9   :  { %727 = vpow2.f32 %v679_v57 }
 0x9ad   :  { %v726_v56 = vpop.eup %725 }
 0x9ae   :  { %390 = vrot.lane.b32.xlu1 %v726_v56, %s784_s2 }
 0x9af   :  { %v728_v58 = vpop.eup %727 }
 0x9b0   :  { %v371_v59 = vadd.f32 1.0, %v728_v58 }
 0x9b2   :  { %729 = vrcp.f32 %v371_v59  ;;  %v383_v1 = vand.u32 2147483648, %v371_v59  ;;  %vm377_vm4 = vweird.f32 %v371_v59  ;;  %v381_v2 = vand.u32 2147483647, %v371_v59 }
 0x9b4   :  { %v384_v4 = vor.u32 1.1754944e-38, %v383_v1  ;;  %vm382_vm7 = vcmp.eq.f32.partialorder %v381_v2, 8.507059e+37 }
 0x9b8   :  { %v730_v60 = vpop.eup %729 }
 0x9b9   :  { %v373_v61 = vmul.f32 %v730_v60, %v371_v59  ;;  %vm378_vm3 = vweird.f32 %v730_v60 }
 0x9ba   :  { %vm379_vm6 = vmor %vm377_vm4, %vm378_vm3 }
 0x9bb   :  { %v374_v62 = vsub.f32 1.0, %v373_v61 }
 0x9bd   :  { %v375_v63 = vmul.f32 %v730_v60, %v374_v62 }
 0x9bf   :  { %v376_v0 = vadd.f32 %v730_v60, %v375_v63 }
 0x9c1   :  { %v380_v3 = vsel %vm379_vm6, %v730_v60, %v376_v0  ;;  %vm652_vm6 = vcmask 64512  }
 0x9c2   :  { %v385_v6 = vsel %vm382_vm7, %v384_v4, %v380_v3  ;;  %v550_v3 = vld [vmem:[#allocation2 + $0x7] sm:$0x1] }
 0x9c3   :  { %v388_v8 = vmul.f32 %v385_v6, %v328_v48 }
 0xa20   :  { %v391_v5 = vpop.permute.xlu1 %390 }
 0xa21   :  { %v393_v7 = vmul.f32 %v391_v5, %v385_v6 }
 0xa23   :  { %395 = vrot.lane.b32.xlu2 %v393_v7, %s785_s3 }
 0xa7d   :  { %v396_v9 = vpop.permute.xlu2 %395 }
 0xa7e   :  { %v398_v10 = vadd.f32 %v396_v9, %v388_v8 }
 0xa80   :  { %731 = vtanh.f32 %v398_v10 }
 0xa86   :  { %v732_v11 = vpop.eup %731 }
 0xa87   :  { %401 = vrot.lane.b32.xlu0 %v732_v11, %s784_s2 }
 0xaf9   :  { %v402_v12 = vpop.permute.xlu0 %401 }
 0xafa   :  { %v404_v13 = vmul.f32 %v402_v12, %v385_v6 }
 0xafc   :  { %406 = vrot.lane.b32.xlu1 %v404_v13, %s785_s3 }
 0xb6e   :  { %v407_v14 = vpop.permute.xlu1 %406 }
 0xb6f   :  { %409 = vst.msk [vmem:[#allocation3 + $0x4] sm:$0x1] %vm128_vm5, %v407_v14  ;;  %680 = vmatmul.msk.f32.vlgmr.msrb.gmra.mxu2 %vm33_vm0, %v407_v14 }
 0xbf2   :  { %v434_v16 = vpop.f32.mrf.mxu2 }
 0xbf3   :  { %v437_v17 = vadd.f32 %v434_v16, %v410_v15 }
 0xbf5   :  { %733 = vtanh.f32 %v437_v17  ;;  %v681_v19 = vmul.f32 -1.442695, %v437_v17 }
 0xbf7   :  { %735 = vpow2.f32 %v681_v19 }
 0xbfb   :  { %v734_v18 = vpop.eup %733 }
 0xbfc   :  { %460 = vrot.lane.b32.xlu2 %v734_v18, %s784_s2 }
 0xbfd   :  { %v736_v20 = vpop.eup %735 }
 0xbfe   :  { %v441_v21 = vadd.f32 1.0, %v736_v20 }
 0xc00   :  { %737 = vrcp.f32 %v441_v21  ;;  %v453_v27 = vand.u32 2147483648, %v441_v21  ;;  %vm447_vm9 = vweird.f32 %v441_v21  ;;  %v451_v28 = vand.u32 2147483647, %v441_v21 }
 0xc02   :  { %v454_v30 = vor.u32 1.1754944e-38, %v453_v27  ;;  %vm452_vm11 = vcmp.eq.f32.partialorder %v451_v28, 8.507059e+37  ;;  %v624_v28 = vld [vmem:[%s923_s4 + $0x18] sm:$0xff] }
 0xc03   :  { %644 = vmatpush.msra.mxu1 %v624_v28 }
 0xc06   :  { %v738_v22 = vpop.eup %737 }
 0xc07   :  { %v443_v23 = vmul.f32 %v738_v22, %v441_v21  ;;  %vm448_vm8 = vweird.f32 %v738_v22 }
 0xc08   :  { %vm449_vm10 = vmor %vm447_vm9, %vm448_vm8 }
 0xc09   :  { %v444_v24 = vsub.f32 1.0, %v443_v23 }
 0xc0b   :  { %v445_v25 = vmul.f32 %v738_v22, %v444_v24 }
 0xc0d   :  { %v446_v26 = vadd.f32 %v738_v22, %v445_v25 }
 0xc0f   :  { %v450_v29 = vsel %vm449_vm10, %v738_v22, %v446_v26 }
 0xc10   :  { %v455_v32 = vsel %vm452_vm11, %v454_v30, %v450_v29  ;;  %v623_v29 = vld [vmem:[%s923_s4 + $0x10] sm:$0xff]  ;;  %v622_v30 = vld [vmem:[%s923_s4 + $0x8] sm:$0xff] }
 0xc11   :  { %v458_v34 = vmul.f32 %v455_v32, %v398_v10  ;;  %645 = vmatpush.msra.mxu1 %v623_v29 }
 0xc13   :  { %646 = vmatpush.msra.mxu1 %v622_v30 }
 0xc56   :  { %v461_v31 = vpop.permute.xlu2 %460 }
 0xc57   :  { %v463_v33 = vmul.f32 %v461_v31, %v455_v32  ;;  %v621_v31 = vld [vmem:[%s923_s4] sm:$0xff] }
 0xc58   :  { %647 = vmatpush.msra.mxu1 %v621_v31 }
 0xc59   :  { %465 = vrot.lane.b32.xlu0 %v463_v33, %s785_s3 }
 0xccb   :  { %v466_v35 = vpop.permute.xlu0 %465 }
 0xccc   :  { %v468_v36 = vadd.f32 %v466_v35, %v458_v34  ;;  %v692_v34 = vld [vmem:[%s924_s5] ss:$0 sm:$0xff] }
 0xcce   :  { %739 = vtanh.f32 %v468_v36 }
 0xcd4   :  { %v740_v37 = vpop.eup %739 }
 0xcd5   :  { %471 = vrot.lane.b32.xlu1 %v740_v37, %s784_s2 }
 0xd47   :  { %v472_v38 = vpop.permute.xlu1 %471 }
 0xd48   :  { %v474_v39 = vmul.f32 %v472_v38, %v455_v32 }
 0xd4a   :  { %476 = vrot.lane.b32.xlu2 %v474_v39, %s785_s3 }
 0xda4   :  { %v477_v40 = vpop.permute.xlu2 %476 }
 0xda5   :  { %479 = vst.msk [vmem:[#allocation3 + $0x5] sm:$0x1] %vm128_vm5, %v477_v40  ;;  %682 = vmatmul.msk.f32.vlgmr.msrb.gmra.mxu3 %vm33_vm0, %v477_v40 }
 0xe28   :  { %v504_v42 = vpop.f32.mrf.mxu3 }
 0xe29   :  { %v507_v43 = vadd.f32 %v504_v42, %v480_v41 }
 0xe2b   :  { %741 = vtanh.f32 %v507_v43  ;;  %v683_v45 = vmul.f32 -1.442695, %v507_v43 }
 0xe2d   :  { %743 = vpow2.f32 %v683_v45 }
 0xe31   :  { %v742_v44 = vpop.eup %741 }
 0xe32   :  { %530 = vrot.lane.b32.xlu0 %v742_v44, %s784_s2 }
 0xe33   :  { %v744_v46 = vpop.eup %743 }
 0xe34   :  { %v511_v47 = vadd.f32 1.0, %v744_v46 }
 0xe36   :  { %745 = vrcp.f32 %v511_v47  ;;  %v523_v53 = vand.u32 2147483648, %v511_v47  ;;  %vm517_vm13 = vweird.f32 %v511_v47  ;;  %v521_v54 = vand.u32 2147483647, %v511_v47 }
 0xe38   :  { %v524_v56 = vor.u32 1.1754944e-38, %v523_v53  ;;  %vm522_vm15 = vcmp.eq.f32.partialorder %v521_v54, 8.507059e+37 }
 0xe3c   :  { %v746_v48 = vpop.eup %745 }
 0xe3d   :  { %v513_v49 = vmul.f32 %v746_v48, %v511_v47  ;;  %vm518_vm12 = vweird.f32 %v746_v48 }
 0xe3e   :  { %vm519_vm14 = vmor %vm517_vm13, %vm518_vm12 }
 0xe3f   :  { %v514_v50 = vsub.f32 1.0, %v513_v49 }
 0xe41   :  { %v515_v51 = vmul.f32 %v746_v48, %v514_v50 }
 0xe43   :  { %v516_v52 = vadd.f32 %v746_v48, %v515_v51 }
 0xe45   :  { %v520_v55 = vsel %vm519_vm14, %v746_v48, %v516_v52 }
 0xe46   :  { %v525_v58 = vsel %vm522_vm15, %v524_v56, %v520_v55 }
 0xe47   :  { %v528_v60 = vmul.f32 %v525_v58, %v468_v36 }
 0xea4   :  { %v531_v57 = vpop.permute.xlu0 %530 }
 0xea5   :  { %v533_v59 = vmul.f32 %v531_v57, %v525_v58 }
 0xea7   :  { %535 = vrot.lane.b32.xlu1 %v533_v59, %s785_s3 }
 0xf19   :  { %v536_v61 = vpop.permute.xlu1 %535 }
 0xf1a   :  { %v538_v62 = vadd.f32 %v536_v61, %v528_v60 }
 0xf1c   :  { %747 = vtanh.f32 %v538_v62 }
 0xf22   :  { %v748_v63 = vpop.eup %747 }
 0xf23   :  { %541 = vrot.lane.b32.xlu2 %v748_v63, %s784_s2 }
 0xf7d   :  { %v542_v0 = vpop.permute.xlu2 %541 }
 0xf7e   :  { %v544_v1 = vmul.f32 %v542_v0, %v525_v58 }
 0xf80   :  { %546 = vrot.lane.b32.xlu0 %v544_v1, %s785_s3 }
 0xff2   :  { %v547_v2 = vpop.permute.xlu0 %546 }
 0xff3   :  { %549 = vst.msk [vmem:[#allocation3 + $0x6] sm:$0x1] %vm128_vm5, %v547_v2  ;;  %684 = vmatmul.msk.f32.vlgmr.msra.gmra.mxu0 %vm33_vm0, %v547_v2 }
0x1070   :  { %v574_v4 = vpop.f32.mrf.mxu0 }
0x1071   :  { %v577_v5 = vadd.f32 %v574_v4, %v550_v3 }
0x1073   :  { %749 = vtanh.f32 %v577_v5  ;;  %v685_v7 = vmul.f32 -1.442695, %v577_v5 }
0x1075   :  { %751 = vpow2.f32 %v685_v7 }
0x1079   :  { %v750_v6 = vpop.eup %749 }
0x107a   :  { %600 = vrot.lane.b32.xlu1 %v750_v6, %s784_s2 }
0x107b   :  { %v752_v8 = vpop.eup %751 }
0x107c   :  { %v581_v9 = vadd.f32 1.0, %v752_v8 }
0x107e   :  { %753 = vrcp.f32 %v581_v9  ;;  %v593_v15 = vand.u32 2147483648, %v581_v9  ;;  %vm587_vm2 = vweird.f32 %v581_v9  ;;  %v591_v16 = vand.u32 2147483647, %v581_v9 }
0x1080   :  { %v594_v18 = vor.u32 1.1754944e-38, %v593_v15  ;;  %vm592_vm4 = vcmp.eq.f32.partialorder %v591_v16, 8.507059e+37 }
0x1084   :  { %v754_v10 = vpop.eup %753 }
0x1085   :  { %v583_v11 = vmul.f32 %v754_v10, %v581_v9  ;;  %vm588_vm1 = vweird.f32 %v754_v10 }
0x1086   :  { %vm589_vm3 = vmor %vm587_vm2, %vm588_vm1 }
0x1087   :  { %v584_v12 = vsub.f32 1.0, %v583_v11 }
0x1089   :  { %v585_v13 = vmul.f32 %v754_v10, %v584_v12 }
0x108b   :  { %v586_v14 = vadd.f32 %v754_v10, %v585_v13 }
0x108d   :  { %v590_v17 = vsel %vm589_vm3, %v754_v10, %v586_v14 }
0x108e   :  { %v595_v20 = vsel %vm592_vm4, %v594_v18, %v590_v17 }
0x108f   :  { %v598_v22 = vmul.f32 %v595_v20, %v538_v62 }
0x10ec   :  { %v601_v19 = vpop.permute.xlu1 %600 }
0x10ed   :  { %v603_v21 = vmul.f32 %v601_v19, %v595_v20 }
0x10ef   :  { %605 = vrot.lane.b32.xlu2 %v603_v21, %s785_s3 }
0x1149   :  { %v606_v23 = vpop.permute.xlu2 %605 }
0x114a   :  { %v608_v24 = vadd.f32 %v606_v23, %v598_v22 }
0x114c   :  { %755 = vtanh.f32 %v608_v24 }
0x1152   :  { %v756_v25 = vpop.eup %755 }
0x1153   :  { %611 = vrot.lane.b32.xlu0 %v756_v25, %s784_s2 }
0x11c5   :  { %v612_v26 = vpop.permute.xlu0 %611 }
0x11c6   :  { %v614_v27 = vmul.f32 %v612_v26, %v595_v20 }
0x11c8   :  { %616 = vrot.lane.b32.xlu1 %v614_v27, %s785_s3 }
0x123a   :  { %v617_v32 = vpop.permute.xlu1 %616 }
0x123b   :  { %619 = vst.msk [vmem:[#allocation3 + $0x7] sm:$0x1] %vm128_vm5, %v617_v32 }
0x1242   :  { %v620_v33 = vld [vmem:[#allocation3] sm:$0xff] }
0x1243   :  { %686 = vmatmul.msk.f32.vlgmr.msra.gmra.mxu1 %vm33_vm0, %v620_v33 }
0x12c0   :  { %v649_v35 = vpop.f32.mrf.mxu1 }
0x12c1   :  { %v650_v36 = vadd.f32 %v692_v34, %v649_v35 }
0x12c3   :  { %653 = vst.msk [vmem:[#allocation4] sm:$0xff] %vm652_vm6, %v650_v36 }
0x12c4   :  { %664 = dma.vmem_to_hbm [thread:$0]  %s660_s26, 128, %s662_s29, [#allocation5]  }
0x12c5   :  { %781 = dma.done.wait [#allocation5], 128  }
0x12c6   :  { %782 = vsyncadd [#allocation5], 4294967168 }
0x12c7   :  { %669 = vsyncpa [#allocation5], 1 }

</bundles_post_ra>
